<compile_context>
chip_gen: v6e
topology: v6e:2x2x1
jax: 0.10.0
libtpu: 0.0.40
codegen_flags: <defaults>
</compile_context>

<pallas_src>
import functools
import math

import jax
import jax.numpy as jnp
from jax.experimental import pallas as pl
from jax.experimental.pallas import tpu as pltpu


def _tcn_kernel(x_ref, w1_ref, b1_ref, w2_ref, b2_ref, o_ref, *, Lp):
    """Fused TCN forward for one batch block.

    x_ref  : (C, nb*Lp)              input tile (nb batch segments on lanes)
    w*_ref : (levels, K, C, C) bf16  per-tap weights, w[lvl, k, o, i]
    b*_ref : (levels, C, 1)    f32   biases
    o_ref  : (C, nb*Lp)              output tile
    """
    C, W = x_ref.shape
    num_levels, K = w1_ref.shape[0], w1_ref.shape[1]

    act = x_ref[...]                                    # (C, W) f32

    # Lane position within its length-Lp batch segment.  Used to (a) zero the
    # causal left-pad region of every shifted tap and (b) stop the roll from
    # leaking the previous segment's tail (or the slab's wrap-around) into the
    # head of the next segment.
    pos = jax.lax.broadcasted_iota(jnp.int32, (C, W), 1) % Lp

    for level in range(num_levels):                     # static: few levels
        d = 2 ** level

        def causal_conv(src, w_lvl, b_lvl, d=d):
            # Tap K-1 is the unshifted view; taps k < K-1 are src shifted right
            # by (K-1-k)*d via an XLU roll with the first `shift` lanes of each
            # segment zeroed.  One small bf16 MXU matmul per tap, accumulated
            # in f32 — no concat copy, no scratch store, no unaligned loads.
            src_bf = src.astype(jnp.bfloat16)
            acc = jnp.dot(w_lvl[K - 1], src_bf,
                          preferred_element_type=jnp.float32)
            for k in range(K - 1):
                shift = (K - 1 - k) * d
                tap = pltpu.roll(src, shift, axis=1)
                tap = jnp.where(pos < shift, 0.0, tap).astype(jnp.bfloat16)
                acc = acc + jnp.dot(w_lvl[k], tap,
                                    preferred_element_type=jnp.float32)
            return jnp.maximum(acc + b_lvl, 0.0)         # bias + ReLU (f32)

        h = causal_conv(act, w1_ref[level], b1_ref[level])   # conv1 + relu
        # dropout1: identity (eval mode)
        h = causal_conv(h, w2_ref[level], b2_ref[level])     # conv2 + relu
        # dropout2: identity
        act = jnp.maximum(h + act, 0.0)      # identity shortcut + final relu

    o_ref[...] = act


def _vmem_budget_bytes():
    """~75% of this chip's per-core VMEM; conservative fallback if unknown."""
    try:
        cap = int(pltpu.get_tpu_info().vmem_capacity_bytes)
    except Exception:
        cap = 64 * 1024 * 1024            # v7x per-TensorCore VMEM (smallest)
    return (cap * 3) // 4


def _pick_batch_block(N, C, Lp, budget_bytes):
    """Largest nb that divides N, fits VMEM, and keeps >=2 parallel grid steps
    (so both v7x TensorCores get fed whenever N >= 2)."""
    best = 1
    for nb in range(1, N + 1):
        if N % nb:
            continue
        if N >= 2 and (N // nb) < 2:
            continue
        act_bytes = C * nb * Lp * 4
        # 2x double-buffered input tile + 2x output tile + ~6 live (C, nb*Lp)
        # f32 temporaries inside the body (act, tap, acc, h, residual, ...).
        if act_bytes * (2 + 2 + 6) <= budget_bytes:
            best = nb
    return best


def temporal_conv_net(x, params, kernel_size):
    """Run the full TCN (all levels) in a single pallas_call."""
    N, C, L = x.shape
    num_levels = len(params)
    K = kernel_size

    # Lane-dense length: pad L (right, zeros) once to a multiple of 128.  Safe
    # because the conv is strictly causal (padded positions never feed real
    # positions); sliced off at the end.
    Lp = -(-L // 128) * 128
    xw = x if Lp == L else jnp.pad(x, ((0, 0), (0, 0), (0, Lp - L)))

    # Lane-dense slab: channels on sublanes, (batch, time) on lanes.  Pure
    # wrapper-side layout plumbing done once by XLA.
    x2d = jnp.transpose(xw, (1, 0, 2)).reshape(C, N * Lp)

    budget = _vmem_budget_bytes()
    nb = _pick_batch_block(N, C, Lp, budget)

    # Stack per-level parameters; weights to bf16 once (MXU-native), biases f32.
    w1 = jnp.stack([p["w1"] for p in params]).astype(jnp.bfloat16)  # (lvl,K,C,C)
    b1 = jnp.stack([p["b1"] for p in params])                       # (lvl,C,1)
    w2 = jnp.stack([p["w2"] for p in params]).astype(jnp.bfloat16)
    b2 = jnp.stack([p["b2"] for p in params])

    # VMEM limit from the real footprint (+25% headroom), capped by the chip
    # budget — no hardcoded 32 MiB ceiling.
    act_bytes = C * nb * Lp * 4
    param_bytes = 2 * (int(w1.size) * 2 + int(b1.size) * 4) * 2   # double-buffered
    footprint = act_bytes * (2 + 2 + 6) + param_bytes
    vmem_limit = int(min(budget, max(footprint * 5 // 4, 16 * 1024 * 1024)))

    kernel = functools.partial(_tcn_kernel, Lp=Lp)
    out2d = pl.pallas_call(
        kernel,
        out_shape=jax.ShapeDtypeStruct((C, N * Lp), jnp.float32),
        grid_spec=pltpu.PrefetchScalarGridSpec(
            num_scalar_prefetch=0,
            grid=(N // nb,),
            in_specs=[
                pl.BlockSpec((C, nb * Lp), lambda i: (0, i)),
                pl.BlockSpec((num_levels, K, C, C), lambda i: (0, 0, 0, 0)),
                pl.BlockSpec((num_levels, C, 1), lambda i: (0, 0, 0)),
                pl.BlockSpec((num_levels, K, C, C), lambda i: (0, 0, 0, 0)),
                pl.BlockSpec((num_levels, C, 1), lambda i: (0, 0, 0)),
            ],
            out_specs=pl.BlockSpec((C, nb * Lp), lambda i: (0, i)),
        ),
        compiler_params=pltpu.CompilerParams(
            dimension_semantics=("parallel",),
            vmem_limit_bytes=vmem_limit),
    )(x2d, w1, b1, w2, b2)

    out = jnp.transpose(out2d.reshape(C, N, Lp), (1, 0, 2))
    return out[:, :, :L]


# ----------------------------- parameter setup -----------------------------
def make_wn_conv_params(key, out_c, in_c, kernel_size):
    """weight_norm'ed Conv1d parameters in per-tap (K, out, in) layout."""
    kv, kb = jax.random.split(key)
    v = 0.01 * jax.random.normal(kv, (out_c, in_c, kernel_size), jnp.float32)
    norm = jnp.sqrt(jnp.sum(v * v, axis=(1, 2), keepdims=True))
    g = norm                                   # weight_norm: g init to ||v||
    w = g * v / norm                           # effective weight (== v at init)
    bound = 1.0 / math.sqrt(in_c * kernel_size)
    b = jax.random.uniform(kb, (out_c,), jnp.float32, -bound, bound)
    w_taps = jnp.transpose(w, (2, 0, 1))       # w_taps[k, o, i] = w[o, i, k]
    return w_taps, b.reshape(out_c, 1)


def init_tcn_params(key, num_inputs, num_channels, kernel_size):
    in_channels = [num_inputs] + list(num_channels)
    params = []
    for i in range(len(num_channels)):
        assert in_channels[i] == in_channels[i + 1], (
            "reference forward is only well-defined for in == out channels")
        key, k1, k2 = jax.random.split(key, 3)
        w1, b1 = make_wn_conv_params(k1, in_channels[i + 1], in_channels[i],
                                     kernel_size)
        w2, b2 = make_wn_conv_params(k2, in_channels[i + 1], in_channels[i],
                                     kernel_size)
        params.append({"w1": w1, "b1": b1, "w2": w2, "b2": b2})
    return params


# ---------------- pure-JAX reference (for a correctness check) ----------------
def _ref_causal_conv(x, w_taps, b, dilation):
    # Matches the kernel's precision: bf16 operands, f32 accumulation.
    K, out_c, _ = w_taps.shape
    N, C, L = x.shape
    pad = (K - 1) * dilation
    xp = jnp.pad(x, ((0, 0), (0, 0), (pad, 0))).astype(jnp.bfloat16)
    wb = w_taps.astype(jnp.bfloat16)
    y = jnp.zeros((N, out_c, L), jnp.float32) + b.reshape(1, -1, 1)
    for k in range(K):
        y = y + jnp.einsum("oi,nil->nol", wb[k],
                           xp[:, :, k * dilation:k * dilation + L],
                           preferred_element_type=jnp.float32)
    return y


def _ref_tcn(x, params, kernel_size):
    for i, p in enumerate(params):
        d = 2 ** i
        h = jnp.maximum(_ref_causal_conv(x, p["w1"], p["b1"], d), 0.0)
        h = jnp.maximum(_ref_causal_conv(h, p["w2"], p["b2"], d), 0.0)
        x = jnp.maximum(h + x, 0.0)
    return x


if __name__ == "__main__":
    key = jax.random.PRNGKey(0)
    N, C, L = 4, 16, 128
    kernel_size = 2
    num_channels = [C, C, C]          # three levels, dilations 1, 2, 4

    kx, kp = jax.random.split(key)
    x = jax.random.normal(kx, (N, C, L), jnp.float32)
    params = init_tcn_params(kp, C, num_channels, kernel_size)

    out = jax.block_until_ready(temporal_conv_net(x, params, kernel_size))

    ref = _ref_tcn(x, params, kernel_size)
    assert out.shape == (N, C, L)
    assert jnp.allclose(out, ref, atol=1e-3, rtol=1e-3), (
        float(jnp.max(jnp.abs(out - ref))))
    print("KERNEL_OK")
</pallas_src>

<mosaic_0001>
module attributes {stable_mosaic.version = 11 : i64} {
  func.func @_tcn_kernel(%arg0: i32, %arg1: memref<16x256xf32, #tpu.memory_space<vmem>>, %arg2: memref<3x2x16x16xbf16, #tpu.memory_space<vmem>>, %arg3: memref<3x16x1xf32, #tpu.memory_space<vmem>>, %arg4: memref<3x2x16x16xbf16, #tpu.memory_space<vmem>>, %arg5: memref<3x16x1xf32, #tpu.memory_space<vmem>>, %arg6: memref<16x256xf32, #tpu.memory_space<vmem>>) attributes {dimension_semantics = [#tpu.dimension_semantics<parallel>], iteration_bounds = array<i64: 2>, scalar_prefetch = 0 : i64, scratch_operands = 0 : i64, tpu.core_type = #tpu.core_type<tc>, window_params = [{transform_indices = @transform_0, window_bounds = array<i64: 16, 256>}, {pipeline_mode = #tpu.pipeline_mode<synchronous>, transform_indices = @transform_1, window_bounds = array<i64: 3, 2, 16, 16>}, {pipeline_mode = #tpu.pipeline_mode<synchronous>, transform_indices = @transform_2, window_bounds = array<i64: 3, 16, 1>}, {pipeline_mode = #tpu.pipeline_mode<synchronous>, transform_indices = @transform_3, window_bounds = array<i64: 3, 2, 16, 16>}, {pipeline_mode = #tpu.pipeline_mode<synchronous>, transform_indices = @transform_4, window_bounds = array<i64: 3, 16, 1>}, {transform_indices = @transform_5, window_bounds = array<i64: 16, 256>}]} {
    %c0 = arith.constant 0 : index
    %c0_0 = arith.constant 0 : index
    %0 = vector.load %arg1[%c0, %c0_0] : memref<16x256xf32, #tpu.memory_space<vmem>>, vector<16x256xf32>
    %1 = tpu.iota {dimensions = array<i32: 1>} : vector<16x256xi32>
    %c128_i32 = arith.constant 128 : i32
    %c0_i32 = arith.constant 0 : i32
    %2 = arith.cmpi eq, %c128_i32, %c0_i32 : i32
    %c1_i32 = arith.constant 1 : i32
    %3 = arith.select %2, %c1_i32, %c128_i32 : i32
    %4 = vector.broadcast %3 : i32 to vector<16x256xi32>
    %5 = arith.remsi %1, %4 : vector<16x256xi32>
    %c0_i32_1 = arith.constant 0 : i32
    %6 = vector.broadcast %c0_i32_1 : i32 to vector<16x256xi32>
    %7 = arith.cmpi ne, %5, %6 : vector<16x256xi32>
    %c0_i32_2 = arith.constant 0 : i32
    %8 = vector.broadcast %c0_i32_2 : i32 to vector<16x256xi32>
    %9 = arith.cmpi slt, %5, %8 : vector<16x256xi32>
    %c0_i32_3 = arith.constant 0 : i32
    %10 = arith.cmpi slt, %3, %c0_i32_3 : i32
    %11 = vector.broadcast %10 : i1 to vector<16x256xi1>
    %12 = vector.broadcast %11 : vector<16x256xi1> to vector<16x256xi1>
    %13 = arith.xori %9, %12 : vector<16x256xi1>
    %14 = arith.andi %13, %7 : vector<16x256xi1>
    %15 = vector.broadcast %3 : i32 to vector<16x256xi32>
    %16 = arith.addi %5, %15 : vector<16x256xi32>
    %17 = arith.select %14, %16, %5 : vector<16x256xi1>, vector<16x256xi32>
    %c0_4 = arith.constant 0 : index
    %c0_5 = arith.constant 0 : index
    %c0_6 = arith.constant 0 : index
    %c0_7 = arith.constant 0 : index
    %18 = vector.load %arg2[%c0_4, %c0_5, %c0_6, %c0_7] : memref<3x2x16x16xbf16, #tpu.memory_space<vmem>>, vector<1x2x16x16xbf16>
    %19 = vector.shape_cast %18 : vector<1x2x16x16xbf16> to vector<2x16x16xbf16>
    %c0_8 = arith.constant 0 : index
    %c0_9 = arith.constant 0 : index
    %c0_10 = arith.constant 0 : index
    %20 = vector.load %arg3[%c0_8, %c0_9, %c0_10] : memref<3x16x1xf32, #tpu.memory_space<vmem>>, vector<1x16x1xf32>
    %21 = vector.shape_cast %20 : vector<1x16x1xf32> to vector<16x1xf32>
    %22 = arith.truncf %0 : vector<16x256xf32> to vector<16x256xbf16>
    %23 = vector.extract_strided_slice %19 {offsets = [1, 0, 0], sizes = [1, 16, 16], strides = [1, 1, 1]} : vector<2x16x16xbf16> to vector<1x16x16xbf16>
    %24 = vector.shape_cast %23 : vector<1x16x16xbf16> to vector<16x16xbf16>
    %cst = arith.constant dense<0.000000e+00> : vector<16x256xf32>
    %25 = tpu.matmul %24, %22, %cst {dimension_numbers = #tpu.dot_dimension_numbers<[1], [0], [0], [1], [0, 0, 1, 1], [], []>} : vector<16x16xbf16>, vector<16x256xbf16>, vector<16x256xf32> -> vector<16x256xf32>
    %c1_i32_11 = arith.constant 1 : i32
    %26 = tpu.dynamic_rotate %0 by %c1_i32_11 dim 1 : vector<16x256xf32>, i32 -> vector<16x256xf32>
    %c1_i32_12 = arith.constant 1 : i32
    %27 = vector.broadcast %c1_i32_12 : i32 to vector<16x256xi32>
    %28 = arith.cmpi slt, %17, %27 : vector<16x256xi32>
    %cst_13 = arith.constant 0.000000e+00 : f32
    %29 = vector.broadcast %cst_13 : f32 to vector<16x256xf32>
    %30 = arith.select %28, %29, %26 : vector<16x256xi1>, vector<16x256xf32>
    %31 = arith.truncf %30 : vector<16x256xf32> to vector<16x256xbf16>
    %32 = vector.extract_strided_slice %19 {offsets = [0, 0, 0], sizes = [1, 16, 16], strides = [1, 1, 1]} : vector<2x16x16xbf16> to vector<1x16x16xbf16>
    %33 = vector.shape_cast %32 : vector<1x16x16xbf16> to vector<16x16xbf16>
    %cst_14 = arith.constant dense<0.000000e+00> : vector<16x256xf32>
    %34 = tpu.matmul %33, %31, %cst_14 {dimension_numbers = #tpu.dot_dimension_numbers<[1], [0], [0], [1], [0, 0, 1, 1], [], []>} : vector<16x16xbf16>, vector<16x256xbf16>, vector<16x256xf32> -> vector<16x256xf32>
    %35 = arith.addf %25, %34 : vector<16x256xf32>
    %36 = vector.broadcast %21 : vector<16x1xf32> to vector<16x256xf32>
    %37 = arith.addf %35, %36 : vector<16x256xf32>
    %cst_15 = arith.constant 0.000000e+00 : f32
    %38 = vector.broadcast %cst_15 : f32 to vector<16x256xf32>
    %39 = arith.maximumf %37, %38 : vector<16x256xf32>
    %c0_16 = arith.constant 0 : index
    %c0_17 = arith.constant 0 : index
    %c0_18 = arith.constant 0 : index
    %c0_19 = arith.constant 0 : index
    %40 = vector.load %arg4[%c0_16, %c0_17, %c0_18, %c0_19] : memref<3x2x16x16xbf16, #tpu.memory_space<vmem>>, vector<1x2x16x16xbf16>
    %41 = vector.shape_cast %40 : vector<1x2x16x16xbf16> to vector<2x16x16xbf16>
    %c0_20 = arith.constant 0 : index
    %c0_21 = arith.constant 0 : index
    %c0_22 = arith.constant 0 : index
    %42 = vector.load %arg5[%c0_20, %c0_21, %c0_22] : memref<3x16x1xf32, #tpu.memory_space<vmem>>, vector<1x16x1xf32>
    %43 = vector.shape_cast %42 : vector<1x16x1xf32> to vector<16x1xf32>
    %44 = arith.truncf %39 : vector<16x256xf32> to vector<16x256xbf16>
    %45 = vector.extract_strided_slice %41 {offsets = [1, 0, 0], sizes = [1, 16, 16], strides = [1, 1, 1]} : vector<2x16x16xbf16> to vector<1x16x16xbf16>
    %46 = vector.shape_cast %45 : vector<1x16x16xbf16> to vector<16x16xbf16>
    %cst_23 = arith.constant dense<0.000000e+00> : vector<16x256xf32>
    %47 = tpu.matmul %46, %44, %cst_23 {dimension_numbers = #tpu.dot_dimension_numbers<[1], [0], [0], [1], [0, 0, 1, 1], [], []>} : vector<16x16xbf16>, vector<16x256xbf16>, vector<16x256xf32> -> vector<16x256xf32>
    %c1_i32_24 = arith.constant 1 : i32
    %48 = tpu.dynamic_rotate %39 by %c1_i32_24 dim 1 : vector<16x256xf32>, i32 -> vector<16x256xf32>
    %c1_i32_25 = arith.constant 1 : i32
    %49 = vector.broadcast %c1_i32_25 : i32 to vector<16x256xi32>
    %50 = arith.cmpi slt, %17, %49 : vector<16x256xi32>
    %cst_26 = arith.constant 0.000000e+00 : f32
    %51 = vector.broadcast %cst_26 : f32 to vector<16x256xf32>
    %52 = arith.select %50, %51, %48 : vector<16x256xi1>, vector<16x256xf32>
    %53 = arith.truncf %52 : vector<16x256xf32> to vector<16x256xbf16>
    %54 = vector.extract_strided_slice %41 {offsets = [0, 0, 0], sizes = [1, 16, 16], strides = [1, 1, 1]} : vector<2x16x16xbf16> to vector<1x16x16xbf16>
    %55 = vector.shape_cast %54 : vector<1x16x16xbf16> to vector<16x16xbf16>
    %cst_27 = arith.constant dense<0.000000e+00> : vector<16x256xf32>
    %56 = tpu.matmul %55, %53, %cst_27 {dimension_numbers = #tpu.dot_dimension_numbers<[1], [0], [0], [1], [0, 0, 1, 1], [], []>} : vector<16x16xbf16>, vector<16x256xbf16>, vector<16x256xf32> -> vector<16x256xf32>
    %57 = arith.addf %47, %56 : vector<16x256xf32>
    %58 = vector.broadcast %43 : vector<16x1xf32> to vector<16x256xf32>
    %59 = arith.addf %57, %58 : vector<16x256xf32>
    %cst_28 = arith.constant 0.000000e+00 : f32
    %60 = vector.broadcast %cst_28 : f32 to vector<16x256xf32>
    %61 = arith.maximumf %59, %60 : vector<16x256xf32>
    %62 = arith.addf %61, %0 : vector<16x256xf32>
    %cst_29 = arith.constant 0.000000e+00 : f32
    %63 = vector.broadcast %cst_29 : f32 to vector<16x256xf32>
    %64 = arith.maximumf %62, %63 : vector<16x256xf32>
    %c1 = arith.constant 1 : index
    %c0_30 = arith.constant 0 : index
    %c0_31 = arith.constant 0 : index
    %c0_32 = arith.constant 0 : index
    %65 = vector.load %arg2[%c1, %c0_30, %c0_31, %c0_32] : memref<3x2x16x16xbf16, #tpu.memory_space<vmem>>, vector<1x2x16x16xbf16>
    %66 = vector.shape_cast %65 : vector<1x2x16x16xbf16> to vector<2x16x16xbf16>
    %c1_33 = arith.constant 1 : index
    %c0_34 = arith.constant 0 : index
    %c0_35 = arith.constant 0 : index
    %67 = vector.load %arg3[%c1_33, %c0_34, %c0_35] : memref<3x16x1xf32, #tpu.memory_space<vmem>>, vector<1x16x1xf32>
    %68 = vector.shape_cast %67 : vector<1x16x1xf32> to vector<16x1xf32>
    %69 = arith.truncf %64 : vector<16x256xf32> to vector<16x256xbf16>
    %70 = vector.extract_strided_slice %66 {offsets = [1, 0, 0], sizes = [1, 16, 16], strides = [1, 1, 1]} : vector<2x16x16xbf16> to vector<1x16x16xbf16>
    %71 = vector.shape_cast %70 : vector<1x16x16xbf16> to vector<16x16xbf16>
    %cst_36 = arith.constant dense<0.000000e+00> : vector<16x256xf32>
    %72 = tpu.matmul %71, %69, %cst_36 {dimension_numbers = #tpu.dot_dimension_numbers<[1], [0], [0], [1], [0, 0, 1, 1], [], []>} : vector<16x16xbf16>, vector<16x256xbf16>, vector<16x256xf32> -> vector<16x256xf32>
    %c2_i32 = arith.constant 2 : i32
    %73 = tpu.dynamic_rotate %64 by %c2_i32 dim 1 : vector<16x256xf32>, i32 -> vector<16x256xf32>
    %c2_i32_37 = arith.constant 2 : i32
    %74 = vector.broadcast %c2_i32_37 : i32 to vector<16x256xi32>
    %75 = arith.cmpi slt, %17, %74 : vector<16x256xi32>
    %cst_38 = arith.constant 0.000000e+00 : f32
    %76 = vector.broadcast %cst_38 : f32 to vector<16x256xf32>
    %77 = arith.select %75, %76, %73 : vector<16x256xi1>, vector<16x256xf32>
    %78 = arith.truncf %77 : vector<16x256xf32> to vector<16x256xbf16>
    %79 = vector.extract_strided_slice %66 {offsets = [0, 0, 0], sizes = [1, 16, 16], strides = [1, 1, 1]} : vector<2x16x16xbf16> to vector<1x16x16xbf16>
    %80 = vector.shape_cast %79 : vector<1x16x16xbf16> to vector<16x16xbf16>
    %cst_39 = arith.constant dense<0.000000e+00> : vector<16x256xf32>
    %81 = tpu.matmul %80, %78, %cst_39 {dimension_numbers = #tpu.dot_dimension_numbers<[1], [0], [0], [1], [0, 0, 1, 1], [], []>} : vector<16x16xbf16>, vector<16x256xbf16>, vector<16x256xf32> -> vector<16x256xf32>
    %82 = arith.addf %72, %81 : vector<16x256xf32>
    %83 = vector.broadcast %68 : vector<16x1xf32> to vector<16x256xf32>
    %84 = arith.addf %82, %83 : vector<16x256xf32>
    %cst_40 = arith.constant 0.000000e+00 : f32
    %85 = vector.broadcast %cst_40 : f32 to vector<16x256xf32>
    %86 = arith.maximumf %84, %85 : vector<16x256xf32>
    %c1_41 = arith.constant 1 : index
    %c0_42 = arith.constant 0 : index
    %c0_43 = arith.constant 0 : index
    %c0_44 = arith.constant 0 : index
    %87 = vector.load %arg4[%c1_41, %c0_42, %c0_43, %c0_44] : memref<3x2x16x16xbf16, #tpu.memory_space<vmem>>, vector<1x2x16x16xbf16>
    %88 = vector.shape_cast %87 : vector<1x2x16x16xbf16> to vector<2x16x16xbf16>
    %c1_45 = arith.constant 1 : index
    %c0_46 = arith.constant 0 : index
    %c0_47 = arith.constant 0 : index
    %89 = vector.load %arg5[%c1_45, %c0_46, %c0_47] : memref<3x16x1xf32, #tpu.memory_space<vmem>>, vector<1x16x1xf32>
    %90 = vector.shape_cast %89 : vector<1x16x1xf32> to vector<16x1xf32>
    %91 = arith.truncf %86 : vector<16x256xf32> to vector<16x256xbf16>
    %92 = vector.extract_strided_slice %88 {offsets = [1, 0, 0], sizes = [1, 16, 16], strides = [1, 1, 1]} : vector<2x16x16xbf16> to vector<1x16x16xbf16>
    %93 = vector.shape_cast %92 : vector<1x16x16xbf16> to vector<16x16xbf16>
    %cst_48 = arith.constant dense<0.000000e+00> : vector<16x256xf32>
    %94 = tpu.matmul %93, %91, %cst_48 {dimension_numbers = #tpu.dot_dimension_numbers<[1], [0], [0], [1], [0, 0, 1, 1], [], []>} : vector<16x16xbf16>, vector<16x256xbf16>, vector<16x256xf32> -> vector<16x256xf32>
    %c2_i32_49 = arith.constant 2 : i32
    %95 = tpu.dynamic_rotate %86 by %c2_i32_49 dim 1 : vector<16x256xf32>, i32 -> vector<16x256xf32>
    %c2_i32_50 = arith.constant 2 : i32
    %96 = vector.broadcast %c2_i32_50 : i32 to vector<16x256xi32>
    %97 = arith.cmpi slt, %17, %96 : vector<16x256xi32>
    %cst_51 = arith.constant 0.000000e+00 : f32
    %98 = vector.broadcast %cst_51 : f32 to vector<16x256xf32>
    %99 = arith.select %97, %98, %95 : vector<16x256xi1>, vector<16x256xf32>
    %100 = arith.truncf %99 : vector<16x256xf32> to vector<16x256xbf16>
    %101 = vector.extract_strided_slice %88 {offsets = [0, 0, 0], sizes = [1, 16, 16], strides = [1, 1, 1]} : vector<2x16x16xbf16> to vector<1x16x16xbf16>
    %102 = vector.shape_cast %101 : vector<1x16x16xbf16> to vector<16x16xbf16>
    %cst_52 = arith.constant dense<0.000000e+00> : vector<16x256xf32>
    %103 = tpu.matmul %102, %100, %cst_52 {dimension_numbers = #tpu.dot_dimension_numbers<[1], [0], [0], [1], [0, 0, 1, 1], [], []>} : vector<16x16xbf16>, vector<16x256xbf16>, vector<16x256xf32> -> vector<16x256xf32>
    %104 = arith.addf %94, %103 : vector<16x256xf32>
    %105 = vector.broadcast %90 : vector<16x1xf32> to vector<16x256xf32>
    %106 = arith.addf %104, %105 : vector<16x256xf32>
    %cst_53 = arith.constant 0.000000e+00 : f32
    %107 = vector.broadcast %cst_53 : f32 to vector<16x256xf32>
    %108 = arith.maximumf %106, %107 : vector<16x256xf32>
    %109 = arith.addf %108, %64 : vector<16x256xf32>
    %cst_54 = arith.constant 0.000000e+00 : f32
    %110 = vector.broadcast %cst_54 : f32 to vector<16x256xf32>
    %111 = arith.maximumf %109, %110 : vector<16x256xf32>
    %c2 = arith.constant 2 : index
    %c0_55 = arith.constant 0 : index
    %c0_56 = arith.constant 0 : index
    %c0_57 = arith.constant 0 : index
    %112 = vector.load %arg2[%c2, %c0_55, %c0_56, %c0_57] : memref<3x2x16x16xbf16, #tpu.memory_space<vmem>>, vector<1x2x16x16xbf16>
    %113 = vector.shape_cast %112 : vector<1x2x16x16xbf16> to vector<2x16x16xbf16>
    %c2_58 = arith.constant 2 : index
    %c0_59 = arith.constant 0 : index
    %c0_60 = arith.constant 0 : index
    %114 = vector.load %arg3[%c2_58, %c0_59, %c0_60] : memref<3x16x1xf32, #tpu.memory_space<vmem>>, vector<1x16x1xf32>
    %115 = vector.shape_cast %114 : vector<1x16x1xf32> to vector<16x1xf32>
    %116 = arith.truncf %111 : vector<16x256xf32> to vector<16x256xbf16>
    %117 = vector.extract_strided_slice %113 {offsets = [1, 0, 0], sizes = [1, 16, 16], strides = [1, 1, 1]} : vector<2x16x16xbf16> to vector<1x16x16xbf16>
    %118 = vector.shape_cast %117 : vector<1x16x16xbf16> to vector<16x16xbf16>
    %cst_61 = arith.constant dense<0.000000e+00> : vector<16x256xf32>
    %119 = tpu.matmul %118, %116, %cst_61 {dimension_numbers = #tpu.dot_dimension_numbers<[1], [0], [0], [1], [0, 0, 1, 1], [], []>} : vector<16x16xbf16>, vector<16x256xbf16>, vector<16x256xf32> -> vector<16x256xf32>
    %c4_i32 = arith.constant 4 : i32
    %120 = tpu.dynamic_rotate %111 by %c4_i32 dim 1 : vector<16x256xf32>, i32 -> vector<16x256xf32>
    %c4_i32_62 = arith.constant 4 : i32
    %121 = vector.broadcast %c4_i32_62 : i32 to vector<16x256xi32>
    %122 = arith.cmpi slt, %17, %121 : vector<16x256xi32>
    %cst_63 = arith.constant 0.000000e+00 : f32
    %123 = vector.broadcast %cst_63 : f32 to vector<16x256xf32>
    %124 = arith.select %122, %123, %120 : vector<16x256xi1>, vector<16x256xf32>
    %125 = arith.truncf %124 : vector<16x256xf32> to vector<16x256xbf16>
    %126 = vector.extract_strided_slice %113 {offsets = [0, 0, 0], sizes = [1, 16, 16], strides = [1, 1, 1]} : vector<2x16x16xbf16> to vector<1x16x16xbf16>
    %127 = vector.shape_cast %126 : vector<1x16x16xbf16> to vector<16x16xbf16>
    %cst_64 = arith.constant dense<0.000000e+00> : vector<16x256xf32>
    %128 = tpu.matmul %127, %125, %cst_64 {dimension_numbers = #tpu.dot_dimension_numbers<[1], [0], [0], [1], [0, 0, 1, 1], [], []>} : vector<16x16xbf16>, vector<16x256xbf16>, vector<16x256xf32> -> vector<16x256xf32>
    %129 = arith.addf %119, %128 : vector<16x256xf32>
    %130 = vector.broadcast %115 : vector<16x1xf32> to vector<16x256xf32>
    %131 = arith.addf %129, %130 : vector<16x256xf32>
    %cst_65 = arith.constant 0.000000e+00 : f32
    %132 = vector.broadcast %cst_65 : f32 to vector<16x256xf32>
    %133 = arith.maximumf %131, %132 : vector<16x256xf32>
    %c2_66 = arith.constant 2 : index
    %c0_67 = arith.constant 0 : index
    %c0_68 = arith.constant 0 : index
    %c0_69 = arith.constant 0 : index
    %134 = vector.load %arg4[%c2_66, %c0_67, %c0_68, %c0_69] : memref<3x2x16x16xbf16, #tpu.memory_space<vmem>>, vector<1x2x16x16xbf16>
    %135 = vector.shape_cast %134 : vector<1x2x16x16xbf16> to vector<2x16x16xbf16>
    %c2_70 = arith.constant 2 : index
    %c0_71 = arith.constant 0 : index
    %c0_72 = arith.constant 0 : index
    %136 = vector.load %arg5[%c2_70, %c0_71, %c0_72] : memref<3x16x1xf32, #tpu.memory_space<vmem>>, vector<1x16x1xf32>
    %137 = vector.shape_cast %136 : vector<1x16x1xf32> to vector<16x1xf32>
    %138 = arith.truncf %133 : vector<16x256xf32> to vector<16x256xbf16>
    %139 = vector.extract_strided_slice %135 {offsets = [1, 0, 0], sizes = [1, 16, 16], strides = [1, 1, 1]} : vector<2x16x16xbf16> to vector<1x16x16xbf16>
    %140 = vector.shape_cast %139 : vector<1x16x16xbf16> to vector<16x16xbf16>
    %cst_73 = arith.constant dense<0.000000e+00> : vector<16x256xf32>
    %141 = tpu.matmul %140, %138, %cst_73 {dimension_numbers = #tpu.dot_dimension_numbers<[1], [0], [0], [1], [0, 0, 1, 1], [], []>} : vector<16x16xbf16>, vector<16x256xbf16>, vector<16x256xf32> -> vector<16x256xf32>
    %c4_i32_74 = arith.constant 4 : i32
    %142 = tpu.dynamic_rotate %133 by %c4_i32_74 dim 1 : vector<16x256xf32>, i32 -> vector<16x256xf32>
    %c4_i32_75 = arith.constant 4 : i32
    %143 = vector.broadcast %c4_i32_75 : i32 to vector<16x256xi32>
    %144 = arith.cmpi slt, %17, %143 : vector<16x256xi32>
    %cst_76 = arith.constant 0.000000e+00 : f32
    %145 = vector.broadcast %cst_76 : f32 to vector<16x256xf32>
    %146 = arith.select %144, %145, %142 : vector<16x256xi1>, vector<16x256xf32>
    %147 = arith.truncf %146 : vector<16x256xf32> to vector<16x256xbf16>
    %148 = vector.extract_strided_slice %135 {offsets = [0, 0, 0], sizes = [1, 16, 16], strides = [1, 1, 1]} : vector<2x16x16xbf16> to vector<1x16x16xbf16>
    %149 = vector.shape_cast %148 : vector<1x16x16xbf16> to vector<16x16xbf16>
    %cst_77 = arith.constant dense<0.000000e+00> : vector<16x256xf32>
    %150 = tpu.matmul %149, %147, %cst_77 {dimension_numbers = #tpu.dot_dimension_numbers<[1], [0], [0], [1], [0, 0, 1, 1], [], []>} : vector<16x16xbf16>, vector<16x256xbf16>, vector<16x256xf32> -> vector<16x256xf32>
    %151 = arith.addf %141, %150 : vector<16x256xf32>
    %152 = vector.broadcast %137 : vector<16x1xf32> to vector<16x256xf32>
    %153 = arith.addf %151, %152 : vector<16x256xf32>
    %cst_78 = arith.constant 0.000000e+00 : f32
    %154 = vector.broadcast %cst_78 : f32 to vector<16x256xf32>
    %155 = arith.maximumf %153, %154 : vector<16x256xf32>
    %156 = arith.addf %155, %111 : vector<16x256xf32>
    %cst_79 = arith.constant 0.000000e+00 : f32
    %157 = vector.broadcast %cst_79 : f32 to vector<16x256xf32>
    %158 = arith.maximumf %156, %157 : vector<16x256xf32>
    %c0_80 = arith.constant 0 : index
    %c0_81 = arith.constant 0 : index
    %159 = vector.load %arg6[%c0_80, %c0_81] : memref<16x256xf32, #tpu.memory_space<vmem>>, vector<16x256xf32>
    tpu.vector_store %arg6[%c0_80, %c0_81], %158 {strides = array<i32>} : memref<16x256xf32, #tpu.memory_space<vmem>>, vector<16x256xf32>,
    return
  }
  func.func @transform_0(%arg0: i32) -> (i32, i32) {
    %c0_i32 = arith.constant 0 : i32
    %c0_i32_0 = arith.constant 0 : i32
    return %c0_i32, %arg0 : i32, i32
  }
  func.func @transform_1(%arg0: i32) -> (i32, i32, i32, i32) {
    %c0_i32 = arith.constant 0 : i32
    %c0_i32_0 = arith.constant 0 : i32
    %c0_i32_1 = arith.constant 0 : i32
    %c0_i32_2 = arith.constant 0 : i32
    %c0_i32_3 = arith.constant 0 : i32
    return %c0_i32, %c0_i32_0, %c0_i32_1, %c0_i32_2 : i32, i32, i32, i32
  }
  func.func @transform_2(%arg0: i32) -> (i32, i32, i32) {
    %c0_i32 = arith.constant 0 : i32
    %c0_i32_0 = arith.constant 0 : i32
    %c0_i32_1 = arith.constant 0 : i32
    %c0_i32_2 = arith.constant 0 : i32
    return %c0_i32, %c0_i32_0, %c0_i32_1 : i32, i32, i32
  }
  func.func @transform_3(%arg0: i32) -> (i32, i32, i32, i32) {
    %c0_i32 = arith.constant 0 : i32
    %c0_i32_0 = arith.constant 0 : i32
    %c0_i32_1 = arith.constant 0 : i32
    %c0_i32_2 = arith.constant 0 : i32
    %c0_i32_3 = arith.constant 0 : i32
    return %c0_i32, %c0_i32_0, %c0_i32_1, %c0_i32_2 : i32, i32, i32, i32
  }
  func.func @transform_4(%arg0: i32) -> (i32, i32, i32) {
    %c0_i32 = arith.constant 0 : i32
    %c0_i32_0 = arith.constant 0 : i32
    %c0_i32_1 = arith.constant 0 : i32
    %c0_i32_2 = arith.constant 0 : i32
    return %c0_i32, %c0_i32_0, %c0_i32_1 : i32, i32, i32
  }
  func.func @transform_5(%arg0: i32) -> (i32, i32) {
    %c0_i32 = arith.constant 0 : i32
    %c0_i32_0 = arith.constant 0 : i32
    return %c0_i32, %arg0 : i32, i32
  }
}

</mosaic_0001>

<bundles_post_ra>
// kernel: tpu_custom_call.1
= control target key start
LH: loop header
LB: loop body
LE: loop exit
PB: predicated region body
PF: predicated region fallthrough
CT: control target
= control target key end

     0   :  { %10 = vsyncpa [#allocation4], 0  ;;  %s2197_s0 = inlined_call_operand.vmem [shape: f32[16,512], index: 0, kind: input, shape index: {}]   ;;  %s2198_s1 = inlined_call_operand.hbm [shape: bf16[3,2,16,16], index: 1, kind: input, shape index: {}]   ;;  %s2199_s2 = inlined_call_operand.vmem [shape: f32[3,16,1], index: 2, kind: input, shape index: {}]   ;;  %s2200_s3 = inlined_call_operand.hbm [shape: bf16[3,2,16,16], index: 3, kind: input, shape index: {}]   ;;  %s2201_s4 = inlined_call_operand.vmem [shape: f32[3,16,1], index: 4, kind: input, shape index: {}]   ;;  %s2202_s5 = inlined_call_operand.hbm [shape: f32[16,512], index: 5, kind: output, shape index: {}]  }
   0x1   :  { %11 = vsyncpa [#allocation7], 0 }
   0x2   :  { %12 = vsyncpa [#allocation5], 0 }
   0x3   :  { %14 = vsyncpa [#allocation5 + $0x1], 0  ;;  %s1761_s18 = smov 0   ;;  %s1763_s19 = smov 0  }
   0x4   :  { %s1765_s20 = smov 0   ;;  %s1767_s21 = smov 0  }
   0x5 LB: > { %s1782_s22 = sadd.s32 4294967295, %s1717_s21   ;;  %s1339_s23 = sadd.s32 4294967294, %s1717_s21   ;;  %s1717_s21 = sphi %s1767_s21, %s2231_s21   ;;  %s1713_s20 = sphi %s1765_s20, %s2230_s20   ;;  %s1709_s19 = sphi %s1763_s19, %s2229_s19   ;;  %s1705_s18 = sphi %s1761_s18, %s2228_s18  }
   0x6   : > { %s1786_s24 = sadd.s32 1, %s1717_s21   ;;  %s27_s25 = sadd.s32 1, %s1713_s20 }
   0x7   : > { %s24_s26 = ssub.s32 %s1717_s21, %s1786_s24  ;;  %p34_p0 = scmp.ne.s32.totalorder %s1713_s20, %s1709_s19 }
   0x8   : > { %p25_p1 = scmp.eq.s32.totalorder %s24_s26, 0  ;;  %p35_p2 = scmp.eq.s32.totalorder %s1717_s21, 0 }
   0x9   : > { %p148_p3 = scmp.eq.s32.totalorder %s1782_s22, 1  ;;  %p153_p4 = scmp.ne.s32.totalorder %s1709_s19, %s1705_s18 }
   0xa   : > { %s1798_s27 = scalar_select %p25_p1, %s1713_s20, %s27_s25  }
   0xb   : > { %p1800_p5 = por %p35_p2, %p34_p0  ;;  %p1804_p6 = por %p148_p3, %p34_p0 }
   0xc   : > { %p154_p7 = scmp.eq.s32.totalorder %s1339_s23, 1  ;;  %p1340_p8 = scmp.ge.s32.totalorder %s1717_s21, 1 }
   0xd   : > { %s2206_s29 = scalar_select %p1804_p6, 1, 0 }
   0xe   : > { %p161_p9 = scmp.lt.s32.totalorder %s1717_s21, 3  ;;  %p1810_p10 = por %p154_p7, %p153_p4 }
   0xf   : > { %p2203_p11 = scmp.eq.s32.totalorder %s1782_s22, 0  ;;  %s1719_s7 = smov [#allocation3]  }
  0x10   : > { %s2207_s30 = scalar_select %p1810_p10, 1, 0 }
  0x11   : > { %p1815_p12 = pnand %p1340_p8, %p161_p9  ;;  %s173_s8 = sshll.u32 %s1719_s7, 4  ;;  %s174_s8 = int_to_ptr.vmem [resolvable:$true] %s173_s8 }
  0x12   : > { %s1720_s10 = smov [#allocation6]   ;;  %s1608_s12 = scalar_lea.vmem %s174_s8, 768 }
  0x13   : > { %p1464_p13 = pneg %p1815_p12  ;;  %s189_s11 = sshll.u32 %s1720_s10, 4  ;;  %s190_s11 = int_to_ptr.vmem [resolvable:$true] %s189_s11 }
  0x14   : > { %p1609_p2 = scmp.ne.s32.totalorder %s174_s8, %s1608_s12  ;;  %p1616_p7 = scmp.lt.s32.totalorder %s174_s8, %s174_s8 }
  0x15   : > { %p1823_p0 = pnand %p2203_p11, %p1464_p13  ;;  %p1617_p8 = scmp.lt.s32.totalorder %s1608_s12, %s1608_s12 }
  0x17   : > { %p1599_p1 = pneg %p1823_p0  ;;  %p1618_p9 = por %p1617_p8, %p1616_p7 }
  0x19   : > { %p1611_p3 = pnand %p1609_p2, %p1599_p1 }
  0x1b   : > { %p1612_p4 = pneg %p1611_p3 }
  0x1d   : > { %p1619_p13 = pnand %p1618_p9, %p1612_p4 }
  0x1f   : > { %1622 = shalt.err (!%p1619_p13)
}
  0x20   : > { %s1721_s13 = smov 64   ;;  %s1722_s14 = smov 4  }
  0x21   : > { %1467 = dma.hbm_to_vmem [thread:$0]  (!%p1823_p0), %s2198_s1, 768, %s174_s8, [#allocation4], %s1721_s13, %s1721_s13, %s1722_s14  }
  0x22   : > { %s1634_s17 = scalar_lea.vmem %s190_s11, 768  ;;  %p1642_p10 = scmp.lt.s32.totalorder %s190_s11, %s190_s11 }
  0x23   : > { %p1635_p11 = scmp.ne.s32.totalorder %s190_s11, %s1634_s17  ;;  %p1643_p6 = scmp.lt.s32.totalorder %s1634_s17, %s1634_s17 }
  0x25   : > { %p1637_p2 = pnand %p1635_p11, %p1599_p1  ;;  %p1644_p7 = por %p1643_p6, %p1642_p10 }
  0x27   : > { %p1638_p3 = pneg %p1637_p2 }
  0x29   : > { %p1645_p4 = pnand %p1644_p7, %p1638_p3 }
  0x2b   : > { %1648 = shalt.err (!%p1645_p4)
}
  0x2c   : > { %1470 = dma.hbm_to_vmem [thread:$0]  (!%p1823_p0), %s2200_s3, 768, %s190_s11, [#allocation7], %s1721_s13, %s1721_s13, %s1722_s14  }
  0x2d   : > { %p1343_p8 = scmp.ge.s32.totalorder %s1717_s21, 2 }
  0x2f   : > { %202 = sbr.rel (%p1343_p8) target bundleno = 58 (0x3a), region = 32 }
  0x34   : > { %205 = sbr.rel (!%p1800_p5) target bundleno = 58 (0x3a), region = 36  ;;  %s207_s26 = sand.u32 (%p1800_p5), 1, %s1713_s20  }
  0x35   : > { %s1449_s7 = sshll.u32 (%p1800_p5), %s1717_s21, 4  ;;  %s1344_s8 = sshll.u32 (%p1800_p5), %s207_s26, 5 }
  0x36   : > { %s212_s9 = scalar_lea.vmem (%p1800_p5), %s2197_s0, %s1449_s7  ;;  %s209_s11 = scalar_lea.vmem (%p1800_p5), [#allocation2], %s1344_s8 }
  0x37   : > { %v225_v0 = vld [vmem:[%s212_s9] sm:$0xff] (%p1800_p5)  ;;  %v227_v1 = vld [vmem:[%s212_s9 + $0x8] sm:$0xff] (%p1800_p5) }
  0x38   : > { %v229_v2 = vld [vmem:[%s212_s9 + $0x20] sm:$0xff] (%p1800_p5)  ;;  %226 = vst [vmem:[%s209_s11] sm:$0xff] (%p1800_p5), %v225_v0  ;;  %228 = vst [vmem:[%s209_s11 + $0x8] sm:$0xff] (%p1800_p5), %v227_v1  ;;  %v231_v3 = vld [vmem:[%s212_s9 + $0x28] sm:$0xff] (%p1800_p5) }
  0x39   : > { %230 = vst [vmem:[%s209_s11 + $0x10] sm:$0xff] %v229_v2  ;;  %232 = vst [vmem:[%s209_s11 + $0x18] sm:$0xff] %v231_v3 }
  0x3a PF: > { %241 = sbr.rel (%p1815_p12) target bundleno = 2085 (0x825), region = 59  ;;  %s244_s28 = sand.u32 (!%p1815_p12), 1, %s1709_s19  }
  0x3b   : > { %s1860_s13 = sshll.u32 (!%p1815_p12), %s244_s28, 5  ;;  %p2210_p5 = scmp.eq.s32.totalorder (!%p1815_p12), %s1782_s22, 0 }
  0x3c   : > { %s246_s14 = scalar_lea.vmem (!%p1815_p12), [#allocation2], %s1860_s13 }
  0x3f   : > { %1692 = dma.done.wait (%p2210_p5), [#allocation4], 768   ;;  %p2211_p6 = pmov %p2210_p5 }
  0x40   : > { %p2212_p10 = pmov %p2210_p5 }
  0x41   : > { %1694 = vsyncadd (%p2211_p6), [#allocation4], 4294966528 }
  0x42   : > { %1696 = dma.done.wait (%p2212_p10), [#allocation7], 768   ;;  %p2213_p11 = pmov %p2210_p5 }
  0x43   : > { %v1723_v4 = vmov 0   ;;  %v1875_v5 = vld [vmem:[%s246_s14] sm:$0xff]  ;;  %v1877_v6 = vld [vmem:[%s246_s14 + $0x10] sm:$0xff]  ;;  %v1879_v7 = vld [vmem:[%s246_s14 + $0x8] sm:$0xff]  ;;  %s1724_s6 = smov 1   ;;  %vm347_vm0 = vcmask 130048   ;;  %v286_v16 = vlaneseq }
  0x44   : > { %1698 = vsyncadd (%p2213_p11), [#allocation7], 4294966528  ;;  %434 = vmatprep.mubr.bf16.mxu1 %v1723_v4  ;;  %383 = vmatprep.mubr.bf16.mxu0 %v1723_v4  ;;  %v1523_v8 = vpack.i.bf16 %v1877_v6, %v1875_v5  ;;  %v1883_v9 = vld [vmem:[%s246_s14 + $0x18] sm:$0xff]  ;;  %v319_v10 = vpack.c.bf16 %v1877_v6, %v1875_v5  ;;  %v1585_v13 = vld [vmem:[#allocation3 + $0x8] sm:$0xff]   ;;  %s1725_s10 = smov 2   ;;  %s1726_s23 = smov 4  }
  0x45   : > { %1533 = vset.pattern.permute.xlu1 %v1723_v4  ;;  %1544 = vset.pattern.permute.xlu0 %v1723_v4  ;;  %v320_v11 = vpack.c.bf16 %v1883_v9, %v1879_v7  ;;  %v1528_v12 = vpack.i.bf16 %v1883_v9, %v1879_v7  ;;  %v317_v14 = vld [vmem:[%s2199_s2] sm:$0xff]  ;;  %v318_v15 = vld [vmem:[%s2199_s2 + $0x8] sm:$0xff]  ;;  %v1901_v17 = vand.u32 127, %v286_v16  ;;  %v1587_v62 = vld [vmem:[#allocation6 + $0x8] sm:$0xff]   ;;  %s278_s14 = scalar_lea.vmem [#allocation8], %s1860_s13  ;;  %s1450_s15 = sshll.u32 %s1782_s22, 8 }
  0x46   : > { %1524 = vrot.lane.b32.xlu0 %v1523_v8, %s1724_s6  ;;  %447 = vperm.xlu1 %1533, %v317_v14   ;;  %v1586_v34 = vld [vmem:[#allocation3] sm:$0xff]   ;;  %v468_v63 = vld [vmem:[%s2201_s4 + $0x8] sm:$0xff]  ;;  %s2152_s13 = scalar_lea.hbm %s2202_s5, %s1450_s15  ;;  %p2226_p0 = scmp.ne.s32.totalorder %s2206_s29, 0 }
  0x47   : > { %416 = vmatprep.subr.bf16.mxu1 %v320_v11  ;;  %v288_v18 = vadd.s32 128, %v1901_v17  ;;  %vm329_vm1 = vcmp.lt.s32.totalorder %v1901_v17, 1  ;;  %v467_v61 = vld [vmem:[%s2201_s4] sm:$0xff]  ;;  %vm635_vm6 = vcmp.lt.s32.totalorder %v1901_v17, 2  ;;  %vm942_vm11 = vcmp.lt.s32.totalorder %v1901_v17, 4  ;;  %s1727_s25 = smov [#allocation8]  }
  0x48   : > { %417 = vmatpush1.bf16.msra.mxu1 %v319_v10  ;;  %vm1910_vm3 = vmneg %vm329_vm1  ;;  %s1653_s26 = sshll.u32 %s1727_s25, 4  ;;  %s1654_s26 = int_to_ptr.vmem [resolvable:$false] %s1653_s26 }
  0x49   : > { %v1904_v20 = vand.u32 127, %v288_v18  ;;  %vm1360_vm5 = vmpackc.low %vm1910_vm3, %vm1910_vm3  ;;  %v1588_v18 = vld [vmem:[#allocation6] sm:$0xff]   ;;  %s1655_s7 = scalar_lea.vmem %s1654_s26, 1024 }
  0x4a   : > { %1529 = vrot.lane.b32.xlu0 %v1528_v12, %s1724_s6  ;;  %452 = vperm.xlu1 %1533, %v318_v15   ;;  %vm1999_vm8 = vmneg %vm635_vm6 }
  0x4b   : > { %1365 = vmatmul.mubr.msk.bf16.vlgmr.msra.gmra.mxu1 %vm347_vm0, %v1585_v13  ;;  %vm1451_vm2 = vcmp.ge.s32.totalorder %v1904_v20, 1  ;;  %vm1452_vm7 = vcmp.ge.s32.totalorder %v1904_v20, 2  ;;  %vm1390_vm10 = vmpackc.low %vm1999_vm8, %vm1999_vm8  ;;  %vm1453_vm12 = vcmp.ge.s32.totalorder %v1904_v20, 4 }
  0x4c   : > { %580 = vmatprep.mubr.bf16.mxu1 %v1723_v4  ;;  %vm1918_vm4 = vmpackc.low %vm1451_vm2, %vm1451_vm2 }
  0x4d   : > { %vm2011_vm9 = vmpackc.low %vm1452_vm7, %vm1452_vm7 }
  0x4e   : > { %vm2088_vm13 = vmneg %vm942_vm11 }
  0x4f   : > { %vm2100_vm14 = vmpackc.low %vm1453_vm12, %vm1453_vm12 }
  0x50   : > { %vm1422_vm15 = vmpackc.low %vm2088_vm13, %vm2088_vm13 }
  0xb8   : > { %v1525_v19 = vpop.permute.xlu0 %1524 }
  0xb9   : > { %v1527_v22 = vunpack.i.h.bf16 %v1525_v19  ;;  %v1526_v23 = vunpack.i.l.bf16 %v1525_v19 }
  0xbc   : > { %v1530_v21 = vpop.permute.xlu0 %1529 }
  0xbd   : > { %v1532_v24 = vunpack.i.h.bf16 %v1530_v21  ;;  %v1531_v25 = vunpack.i.l.bf16 %v1530_v21 }
  0xbf   : > { %v330_v27 = vsel %vm329_vm1, %v1526_v23, %v1531_v25  ;;  %v331_v28 = vsel %vm329_vm1, %v1527_v22, %v1532_v24  ;;  %v332_v30 = vsel %vm329_vm1, %v1531_v25, %v1526_v23  ;;  %v333_v31 = vsel %vm329_vm1, %v1532_v24, %v1527_v22 }
  0xc0   : > { %v1356_v32 = vpack.c.bf16 %v331_v28, %v330_v27  ;;  %v1361_v33 = vpack.c.bf16 %v333_v31, %v332_v30 }
  0xc1   : > { %v448_v37 = vpop.permute.xlu1 %447 }
  0xc2   : > { %1357 = vmatprep.subr.msk.bf16.mxu0 %vm1918_vm4, %v1356_v32 }
  0xc3   : > { %1362 = vmatpush1.bf16.msk.msra.mxu0 %vm1360_vm5, %v1361_v33 }
  0xc5   : > { %v453_v45 = vpop.permute.xlu1 %452 }
  0xc6   : > { %1363 = vmatmul.mubr.msk.bf16.vlgmr.msra.gmra.mxu0 %vm347_vm0, %v1586_v34 }
  0xc7   : > { %529 = vmatprep.mubr.bf16.mxu0 %v1723_v4 }
 0x10b   : > { %v436_v35 = vpop.f32.mrf.mxu1 }
 0x10d   : > { %v438_v36 = vpop.f32.mrf.mxu1 }
 0x10f   : > { %v440_v40 = vpop.f32.mrf.mxu1 }
 0x111   : > { %v442_v47 = vpop.f32.mrf.mxu1 }
 0x186   : > { %v385_v38 = vpop.f32.mrf.mxu0 }
 0x187   : > { %v437_v39 = vadd.f32 %v436_v35, %v385_v38 }
 0x188   : > { %v387_v41 = vpop.f32.mrf.mxu0 }
 0x189   : > { %v439_v42 = vadd.f32 %v438_v36, %v387_v41  ;;  %v455_v44 = vadd.f32 %v448_v37, %v437_v39 }
 0x18a   : > { %v389_v43 = vpop.f32.mrf.mxu0 }
 0x18b   : > { %v441_v46 = vadd.f32 %v440_v40, %v389_v43  ;;  %v456_v49 = vadd.f32 %v448_v37, %v439_v42  ;;  %v459_v52 = vmax.f32 %v455_v44, 0.0 }
 0x18c   : > { %v391_v48 = vpop.f32.mrf.mxu0 }
 0x18d   : > { %v457_v50 = vadd.f32 %v453_v45, %v441_v46  ;;  %v443_v51 = vadd.f32 %v442_v47, %v391_v48  ;;  %v460_v55 = vmax.f32 %v456_v49, 0.0 }
 0x18f   : > { %v461_v53 = vmax.f32 %v457_v50, 0.0  ;;  %v458_v54 = vadd.f32 %v453_v45, %v443_v51  ;;  %v1589_v51 = vld [vmem:[#allocation3 + $0x18] sm:$0xff]  }
 0x191   : > { %v462_v56 = vmax.f32 %v458_v54, 0.0  ;;  %v1534_v57 = vpack.i.bf16 %v461_v53, %v459_v52  ;;  %v469_v60 = vpack.c.bf16 %v461_v53, %v459_v52  ;;  %v1381_v52 = vld [vmem:[%s2199_s2 + $0x18] sm:$0xff] }
 0x193   : > { %1535 = vrot.lane.b32.xlu0 %v1534_v57, %s1724_s6  ;;  %v1539_v58 = vpack.i.bf16 %v462_v56, %v460_v55  ;;  %v470_v59 = vpack.c.bf16 %v462_v56, %v460_v55 }
 0x195   : > { %1540 = vrot.lane.b32.xlu1 %v1539_v58, %s1724_s6  ;;  %562 = vmatprep.subr.bf16.mxu1 %v470_v59  ;;  %s1249_s6 = sshll.u32 %s278_s14, 4  ;;  %s2146_s6 = int_to_ptr.vmem [resolvable:$true] %s1249_s6 }
 0x196   : > { %563 = vmatpush1.bf16.msra.mxu1 %v469_v60  ;;  %s1649_s22 = scalar_lea.vmem %s2146_s6, 512  ;;  %p1656_p13 = scmp.lt.s32.totalorder %s2146_s6, %s1654_s26 }
 0x197   : > { %593 = vperm.xlu0 %1544, %v467_v61   ;;  %p1650_p12 = scmp.ne.s32.totalorder %s2146_s6, %s1649_s22  ;;  %p1657_p2 = scmp.lt.s32.totalorder %s1655_s7, %s1649_s22 }
 0x199   : > { %598 = vperm.xlu1 %1533, %v468_v63   ;;  %1379 = vmatmul.mubr.msk.bf16.vlgmr.msra.gmra.mxu1 %vm347_vm0, %v1587_v62  ;;  %p1651_p1 = pnand %p1650_p12, %p2226_p0  ;;  %p1658_p3 = por %p1657_p2, %p1656_p13 }
 0x19a   : > { %739 = vmatprep.mubr.bf16.mxu1 %v1723_v4 }
 0x19b   : > { %p1652_p9 = pneg %p1651_p1 }
 0x19d   : > { %p1659_p7 = pnand %p1658_p3, %p1652_p9 }
 0x205   : > { %v1536_v0 = vpop.permute.xlu0 %1535 }
 0x206   : > { %v1538_v2 = vunpack.i.h.bf16 %v1536_v0  ;;  %v1537_v3 = vunpack.i.l.bf16 %v1536_v0 }
 0x207   : > { %v1541_v1 = vpop.permute.xlu1 %1540 }
 0x208   : > { %v1543_v8 = vunpack.i.h.bf16 %v1541_v1  ;;  %v1542_v10 = vunpack.i.l.bf16 %v1541_v1 }
 0x20a   : > { %v479_v11 = vsel %vm329_vm1, %v1537_v3, %v1542_v10  ;;  %v480_v12 = vsel %vm329_vm1, %v1538_v2, %v1543_v8  ;;  %v481_v13 = vsel %vm329_vm1, %v1542_v10, %v1537_v3  ;;  %v482_v14 = vsel %vm329_vm1, %v1543_v8, %v1538_v2  ;;  %v1590_v3 = vld [vmem:[#allocation3 + $0x10] sm:$0xff]  }
 0x20b   : > { %v1370_v15 = vpack.c.bf16 %v480_v12, %v479_v11  ;;  %v1375_v16 = vpack.c.bf16 %v482_v14, %v481_v13 }
 0x20d   : > { %1371 = vmatprep.subr.msk.bf16.mxu0 %vm1918_vm4, %v1370_v15 }
 0x20e   : > { %1376 = vmatpush1.bf16.msk.msra.mxu0 %vm1360_vm5, %v1375_v16 }
 0x211   : > { %1377 = vmatmul.mubr.msk.bf16.vlgmr.msra.gmra.mxu0 %vm347_vm0, %v1588_v18 }
 0x212   : > { %688 = vmatprep.mubr.bf16.mxu0 %v1723_v4  ;;  %v594_v23 = vpop.permute.xlu0 %593 }
 0x214   : > { %v599_v31 = vpop.permute.xlu1 %598 }
 0x259   : > { %v582_v19 = vpop.f32.mrf.mxu1 }
 0x25b   : > { %v584_v21 = vpop.f32.mrf.mxu1 }
 0x25d   : > { %v586_v25 = vpop.f32.mrf.mxu1 }
 0x25f   : > { %v588_v34 = vpop.f32.mrf.mxu1 }
 0x2d1   : > { %v531_v22 = vpop.f32.mrf.mxu0 }
 0x2d2   : > { %v583_v24 = vadd.f32 %v582_v19, %v531_v22 }
 0x2d3   : > { %v533_v27 = vpop.f32.mrf.mxu0 }
 0x2d4   : > { %v601_v28 = vadd.f32 %v594_v23, %v583_v24  ;;  %v585_v29 = vadd.f32 %v584_v21, %v533_v27 }
 0x2d5   : > { %v535_v30 = vpop.f32.mrf.mxu0 }
 0x2d6   : > { %v605_v32 = vmax.f32 %v601_v28, 0.0  ;;  %v602_v33 = vadd.f32 %v594_v23, %v585_v29  ;;  %v587_v26 = vadd.f32 %v586_v25, %v535_v30 }
 0x2d7   : > { %v537_v35 = vpop.f32.mrf.mxu0 }
 0x2d8   : > { %v606_v36 = vmax.f32 %v602_v33, 0.0  ;;  %v603_v37 = vadd.f32 %v599_v31, %v587_v26  ;;  %v589_v38 = vadd.f32 %v588_v34, %v537_v35  ;;  %v609_v39 = vadd.f32 %v605_v32, %v1875_v5 }
 0x2da   : > { %v607_v40 = vmax.f32 %v603_v37, 0.0  ;;  %v604_v41 = vadd.f32 %v599_v31, %v589_v38  ;;  %v610_v42 = vadd.f32 %v606_v36, %v1879_v7  ;;  %v1968_v45 = vmax.f32 %v609_v39, 0.0  ;;  %v1396_v37 = vld [vmem:[%s2201_s4 + $0x10] sm:$0xff]  ;;  %v1591_v38 = vld [vmem:[#allocation6 + $0x18] sm:$0xff]   ;;  %v1397_v39 = vld [vmem:[%s2201_s4 + $0x18] sm:$0xff] }
 0x2dc   : > { %v611_v43 = vadd.f32 %v607_v40, %v1877_v6  ;;  %v608_v44 = vmax.f32 %v604_v41, 0.0  ;;  %v1973_v48 = vmax.f32 %v610_v42, 0.0 }
 0x2de   : > { %v1970_v46 = vmax.f32 %v611_v43, 0.0  ;;  %v612_v47 = vadd.f32 %v608_v44, %v1883_v9  ;;  %v1380_v9 = vld [vmem:[%s2199_s2 + $0x10] sm:$0xff] }
 0x2e0   : > { %v1975_v49 = vmax.f32 %v612_v47, 0.0  ;;  %v1545_v5 = vpack.i.bf16 %v1970_v46, %v1968_v45  ;;  %v625_v50 = vpack.c.bf16 %v1970_v46, %v1968_v45 }
 0x2e2   : > { %1546 = vrot.lane.b32.xlu1 %v1545_v5, %s1725_s10  ;;  %v1550_v6 = vpack.i.bf16 %v1975_v49, %v1973_v48  ;;  %v626_v7 = vpack.c.bf16 %v1975_v49, %v1973_v48 }
 0x2e4   : > { %1551 = vrot.lane.b32.xlu0 %v1550_v6, %s1725_s10  ;;  %721 = vmatprep.subr.bf16.mxu1 %v626_v7 }
 0x2e5   : > { %722 = vmatpush1.bf16.msra.mxu1 %v625_v50 }
 0x2e6   : > { %752 = vperm.xlu1 %1533, %v1380_v9  }
 0x2e8   : > { %757 = vperm.xlu0 %1544, %v1381_v52   ;;  %1395 = vmatmul.mubr.msk.bf16.vlgmr.msra.gmra.mxu1 %vm347_vm0, %v1589_v51  ;;  %v1592_v52 = vld [vmem:[#allocation6 + $0x10] sm:$0xff]  }
 0x2e9   : > { %887 = vmatprep.mubr.bf16.mxu1 %v1723_v4 }
 0x354   : > { %v1547_v53 = vpop.permute.xlu1 %1546 }
 0x355   : > { %v1549_v55 = vunpack.i.h.bf16 %v1547_v53  ;;  %v1548_v56 = vunpack.i.l.bf16 %v1547_v53 }
 0x356   : > { %v1552_v54 = vpop.permute.xlu0 %1551 }
 0x357   : > { %v1554_v57 = vunpack.i.h.bf16 %v1552_v54  ;;  %v1553_v58 = vunpack.i.l.bf16 %v1552_v54 }
 0x359   : > { %v636_v60 = vsel %vm635_vm6, %v1548_v56, %v1553_v58  ;;  %v637_v61 = vsel %vm635_vm6, %v1549_v55, %v1554_v57  ;;  %v638_v62 = vsel %vm635_vm6, %v1553_v58, %v1548_v56  ;;  %v639_v63 = vsel %vm635_vm6, %v1554_v57, %v1549_v55 }
 0x35a   : > { %v1386_v1 = vpack.c.bf16 %v637_v61, %v636_v60  ;;  %v1391_v2 = vpack.c.bf16 %v639_v63, %v638_v62 }
 0x35c   : > { %1387 = vmatprep.subr.msk.bf16.mxu0 %vm2011_vm9, %v1386_v1 }
 0x35d   : > { %1392 = vmatpush1.bf16.msk.msra.mxu0 %vm1390_vm10, %v1391_v2 }
 0x360   : > { %1393 = vmatmul.mubr.msk.bf16.vlgmr.msra.gmra.mxu0 %vm347_vm0, %v1590_v3 }
 0x361   : > { %836 = vmatprep.mubr.bf16.mxu0 %v1723_v4  ;;  %v753_v16 = vpop.permute.xlu1 %752 }
 0x363   : > { %v758_v19 = vpop.permute.xlu0 %757 }
 0x3a8   : > { %v741_v8 = vpop.f32.mrf.mxu1 }
 0x3aa   : > { %v743_v10 = vpop.f32.mrf.mxu1 }
 0x3ac   : > { %v745_v13 = vpop.f32.mrf.mxu1 }
 0x3ae   : > { %v747_v23 = vpop.f32.mrf.mxu1 }
 0x420   : > { %v690_v11 = vpop.f32.mrf.mxu0 }
 0x421   : > { %v742_v12 = vadd.f32 %v741_v8, %v690_v11 }
 0x422   : > { %v692_v14 = vpop.f32.mrf.mxu0 }
 0x423   : > { %v744_v15 = vadd.f32 %v743_v10, %v692_v14  ;;  %v760_v21 = vadd.f32 %v753_v16, %v742_v12 }
 0x424   : > { %v694_v18 = vpop.f32.mrf.mxu0 }
 0x425   : > { %v746_v22 = vadd.f32 %v745_v13, %v694_v18  ;;  %v761_v25 = vadd.f32 %v753_v16, %v744_v15  ;;  %v764_v29 = vmax.f32 %v760_v21, 0.0 }
 0x426   : > { %v696_v24 = vpop.f32.mrf.mxu0 }
 0x427   : > { %v762_v27 = vadd.f32 %v758_v19, %v746_v22  ;;  %v748_v28 = vadd.f32 %v747_v23, %v696_v24  ;;  %v765_v32 = vmax.f32 %v761_v25, 0.0 }
 0x429   : > { %v766_v30 = vmax.f32 %v762_v27, 0.0  ;;  %v763_v31 = vadd.f32 %v758_v19, %v748_v28  ;;  %v1593_v28 = vld [vmem:[#allocation3 + $0x28] sm:$0xff]  }
 0x42b   : > { %v767_v33 = vmax.f32 %v763_v31, 0.0  ;;  %v1555_v26 = vpack.i.bf16 %v766_v30, %v764_v29  ;;  %v776_v36 = vpack.c.bf16 %v766_v30, %v764_v29  ;;  %v1413_v29 = vld [vmem:[%s2199_s2 + $0x28] sm:$0xff] }
 0x42d   : > { %1556 = vrot.lane.b32.xlu1 %v1555_v26, %s1725_s10  ;;  %v1560_v34 = vpack.i.bf16 %v767_v33, %v765_v32  ;;  %v777_v35 = vpack.c.bf16 %v767_v33, %v765_v32 }
 0x42f   : > { %1561 = vrot.lane.b32.xlu0 %v1560_v34, %s1725_s10  ;;  %869 = vmatprep.subr.bf16.mxu1 %v777_v35 }
 0x430   : > { %870 = vmatpush1.bf16.msra.mxu1 %v776_v36 }
 0x431   : > { %900 = vperm.xlu1 %1533, %v1396_v37  }
 0x433   : > { %905 = vperm.xlu0 %1544, %v1397_v39   ;;  %1411 = vmatmul.mubr.msk.bf16.vlgmr.msra.gmra.mxu1 %vm347_vm0, %v1591_v38 }
 0x434   : > { %1046 = vmatprep.mubr.bf16.mxu1 %v1723_v4 }
 0x49f   : > { %v1557_v40 = vpop.permute.xlu1 %1556 }
 0x4a0   : > { %v1559_v42 = vunpack.i.h.bf16 %v1557_v40  ;;  %v1558_v43 = vunpack.i.l.bf16 %v1557_v40 }
 0x4a1   : > { %v1562_v41 = vpop.permute.xlu0 %1561 }
 0x4a2   : > { %v1564_v44 = vunpack.i.h.bf16 %v1562_v41  ;;  %v1563_v47 = vunpack.i.l.bf16 %v1562_v41 }
 0x4a4   : > { %v786_v5 = vsel %vm635_vm6, %v1558_v43, %v1563_v47  ;;  %v787_v6 = vsel %vm635_vm6, %v1559_v42, %v1564_v44  ;;  %v788_v7 = vsel %vm635_vm6, %v1563_v47, %v1558_v43  ;;  %v789_v50 = vsel %vm635_vm6, %v1564_v44, %v1559_v42  ;;  %v1594_v42 = vld [vmem:[#allocation3 + $0x20] sm:$0xff]  }
 0x4a5   : > { %v1402_v9 = vpack.c.bf16 %v787_v6, %v786_v5  ;;  %v1407_v51 = vpack.c.bf16 %v789_v50, %v788_v7 }
 0x4a7   : > { %1403 = vmatprep.subr.msk.bf16.mxu0 %vm2011_vm9, %v1402_v9 }
 0x4a8   : > { %1408 = vmatpush1.bf16.msk.msra.mxu0 %vm1390_vm10, %v1407_v51 }
 0x4ab   : > { %1409 = vmatmul.mubr.msk.bf16.vlgmr.msra.gmra.mxu0 %vm347_vm0, %v1592_v52 }
 0x4ac   : > { %995 = vmatprep.mubr.bf16.mxu0 %v1723_v4  ;;  %v901_v56 = vpop.permute.xlu1 %900 }
 0x4ae   : > { %v906_v0 = vpop.permute.xlu0 %905 }
 0x4f3   : > { %v889_v53 = vpop.f32.mrf.mxu1 }
 0x4f5   : > { %v891_v54 = vpop.f32.mrf.mxu1 }
 0x4f7   : > { %v893_v58 = vpop.f32.mrf.mxu1 }
 0x4f9   : > { %v895_v3 = vpop.f32.mrf.mxu1 }
 0x56b   : > { %v838_v55 = vpop.f32.mrf.mxu0 }
 0x56c   : > { %v890_v57 = vadd.f32 %v889_v53, %v838_v55 }
 0x56d   : > { %v840_v60 = vpop.f32.mrf.mxu0 }
 0x56e   : > { %v908_v61 = vadd.f32 %v901_v56, %v890_v57  ;;  %v892_v62 = vadd.f32 %v891_v54, %v840_v60 }
 0x56f   : > { %v842_v63 = vpop.f32.mrf.mxu0 }
 0x570   : > { %v912_v1 = vmax.f32 %v908_v61, 0.0  ;;  %v909_v2 = vadd.f32 %v901_v56, %v892_v62  ;;  %v894_v59 = vadd.f32 %v893_v58, %v842_v63 }
 0x571   : > { %v844_v8 = vpop.f32.mrf.mxu0 }
 0x572   : > { %v913_v10 = vmax.f32 %v909_v2, 0.0  ;;  %v910_v11 = vadd.f32 %v906_v0, %v894_v59  ;;  %v896_v12 = vadd.f32 %v895_v3, %v844_v8  ;;  %v916_v13 = vadd.f32 %v912_v1, %v1968_v45  ;;  %v1428_v8 = vld [vmem:[%s2201_s4 + $0x20] sm:$0xff] }
 0x574   : > { %v914_v14 = vmax.f32 %v910_v11, 0.0  ;;  %v911_v15 = vadd.f32 %v906_v0, %v896_v12  ;;  %v917_v16 = vadd.f32 %v913_v10, %v1973_v48  ;;  %v2057_v21 = vmax.f32 %v916_v13, 0.0  ;;  %v1595_v10 = vld [vmem:[#allocation6 + $0x28] sm:$0xff]   ;;  %v1429_v11 = vld [vmem:[%s2201_s4 + $0x28] sm:$0xff] }
 0x576   : > { %v918_v18 = vadd.f32 %v914_v14, %v1970_v46  ;;  %v915_v19 = vmax.f32 %v911_v15, 0.0  ;;  %v2062_v24 = vmax.f32 %v917_v16, 0.0 }
 0x578   : > { %v2059_v22 = vmax.f32 %v918_v18, 0.0  ;;  %v919_v23 = vadd.f32 %v915_v19, %v1975_v49  ;;  %v1412_v49 = vld [vmem:[%s2199_s2 + $0x20] sm:$0xff] }
 0x57a   : > { %v2064_v25 = vmax.f32 %v919_v23, 0.0  ;;  %v1565_v45 = vpack.i.bf16 %v2059_v22, %v2057_v21  ;;  %v932_v27 = vpack.c.bf16 %v2059_v22, %v2057_v21 }
 0x57c   : > { %1566 = vrot.lane.b32.xlu1 %v1565_v45, %s1726_s23  ;;  %v1570_v46 = vpack.i.bf16 %v2064_v25, %v2062_v24  ;;  %v933_v48 = vpack.c.bf16 %v2064_v25, %v2062_v24 }
 0x57e   : > { %1571 = vrot.lane.b32.xlu0 %v1570_v46, %s1726_s23  ;;  %1028 = vmatprep.subr.bf16.mxu1 %v933_v48 }
 0x57f   : > { %1029 = vmatpush1.bf16.msra.mxu1 %v932_v27 }
 0x580   : > { %1059 = vperm.xlu1 %1533, %v1412_v49   ;;  %v1596_v49 = vld [vmem:[#allocation6 + $0x20] sm:$0xff]  }
 0x582   : > { %1064 = vperm.xlu0 %1544, %v1413_v29   ;;  %1427 = vmatmul.mubr.msk.bf16.vlgmr.msra.gmra.mxu1 %vm347_vm0, %v1593_v28 }
 0x583   : > { %1194 = vmatprep.mubr.bf16.mxu1 %v1723_v4 }
 0x5ee   : > { %v1567_v30 = vpop.permute.xlu1 %1566 }
 0x5ef   : > { %v1569_v32 = vunpack.i.h.bf16 %v1567_v30  ;;  %v1568_v33 = vunpack.i.l.bf16 %v1567_v30 }
 0x5f0   : > { %v1572_v31 = vpop.permute.xlu0 %1571 }
 0x5f1   : > { %v1574_v26 = vunpack.i.h.bf16 %v1572_v31  ;;  %v1573_v34 = vunpack.i.l.bf16 %v1572_v31 }
 0x5f3   : > { %v943_v36 = vsel %vm942_vm11, %v1568_v33, %v1573_v34  ;;  %v944_v37 = vsel %vm942_vm11, %v1569_v32, %v1574_v26  ;;  %v945_v38 = vsel %vm942_vm11, %v1573_v34, %v1568_v33  ;;  %v946_v20 = vsel %vm942_vm11, %v1574_v26, %v1569_v32 }
 0x5f4   : > { %v1418_v40 = vpack.c.bf16 %v944_v37, %v943_v36  ;;  %v1423_v41 = vpack.c.bf16 %v946_v20, %v945_v38 }
 0x5f6   : > { %1419 = vmatprep.subr.msk.bf16.mxu0 %vm2100_vm14, %v1418_v40 }
 0x5f7   : > { %1424 = vmatpush1.bf16.msk.msra.mxu0 %vm1422_vm15, %v1423_v41 }
 0x5fa   : > { %1425 = vmatmul.mubr.msk.bf16.vlgmr.msra.gmra.mxu0 %vm347_vm0, %v1594_v42 }
 0x5fb   : > { %1143 = vmatprep.mubr.bf16.mxu0 %v1723_v4  ;;  %v1060_v9 = vpop.permute.xlu1 %1059 }
 0x5fd   : > { %v1065_v52 = vpop.permute.xlu0 %1064 }
 0x642   : > { %v1048_v43 = vpop.f32.mrf.mxu1 }
 0x644   : > { %v1050_v44 = vpop.f32.mrf.mxu1 }
 0x646   : > { %v1052_v6 = vpop.f32.mrf.mxu1 }
 0x648   : > { %v1054_v55 = vpop.f32.mrf.mxu1 }
 0x6ba   : > { %v997_v47 = vpop.f32.mrf.mxu0 }
 0x6bb   : > { %v1049_v5 = vadd.f32 %v1048_v43, %v997_v47 }
 0x6bc   : > { %v999_v7 = vpop.f32.mrf.mxu0 }
 0x6bd   : > { %v1051_v50 = vadd.f32 %v1050_v44, %v999_v7  ;;  %v1067_v53 = vadd.f32 %v1060_v9, %v1049_v5 }
 0x6be   : > { %v1001_v51 = vpop.f32.mrf.mxu0 }
 0x6bf   : > { %v1053_v54 = vadd.f32 %v1052_v6, %v1001_v51  ;;  %v1068_v57 = vadd.f32 %v1060_v9, %v1051_v50  ;;  %v1071_v61 = vmax.f32 %v1067_v53, 0.0 }
 0x6c0   : > { %v1003_v56 = vpop.f32.mrf.mxu0 }
 0x6c1   : > { %v1069_v58 = vadd.f32 %v1065_v52, %v1053_v54  ;;  %v1055_v60 = vadd.f32 %v1054_v55, %v1003_v56  ;;  %v1072_v63 = vmax.f32 %v1068_v57, 0.0 }
 0x6c3   : > { %v1073_v62 = vmax.f32 %v1069_v58, 0.0  ;;  %v1070_v4 = vadd.f32 %v1065_v52, %v1055_v60 }
 0x6c5   : > { %v1074_v0 = vmax.f32 %v1070_v4, 0.0  ;;  %v1575_v1 = vpack.i.bf16 %v1073_v62, %v1071_v61  ;;  %v1083_v3 = vpack.c.bf16 %v1073_v62, %v1071_v61 }
 0x6c7   : > { %1576 = vrot.lane.b32.xlu1 %v1575_v1, %s1726_s23  ;;  %v1580_v2 = vpack.i.bf16 %v1074_v0, %v1072_v63  ;;  %v1084_v59 = vpack.c.bf16 %v1074_v0, %v1072_v63 }
 0x6c9   : > { %1581 = vrot.lane.b32.xlu0 %v1580_v2, %s1726_s23  ;;  %1176 = vmatprep.subr.bf16.mxu1 %v1084_v59  ;;  %s2156_s23 = scalar_lea.sflag [#allocation5], %s244_s28 }
 0x6ca   : > { %1177 = vmatpush1.bf16.msra.mxu1 %v1083_v3 }
 0x6cb   : > { %1207 = vperm.xlu1 %1533, %v1428_v8  }
 0x6cd   : > { %1212 = vperm.xlu0 %1544, %v1429_v11   ;;  %1443 = vmatmul.mubr.msk.bf16.vlgmr.msra.gmra.mxu1 %vm347_vm0, %v1595_v10 }
 0x739   : > { %v1577_v12 = vpop.permute.xlu1 %1576 }
 0x73a   : > { %v1579_v14 = vunpack.i.h.bf16 %v1577_v12  ;;  %v1578_v15 = vunpack.i.l.bf16 %v1577_v12 }
 0x73b   : > { %v1582_v13 = vpop.permute.xlu0 %1581 }
 0x73c   : > { %v1584_v16 = vunpack.i.h.bf16 %v1582_v13  ;;  %v1583_v18 = vunpack.i.l.bf16 %v1582_v13 }
 0x73e   : > { %v1093_v19 = vsel %vm942_vm11, %v1578_v15, %v1583_v18  ;;  %v1094_v23 = vsel %vm942_vm11, %v1579_v14, %v1584_v16  ;;  %v1095_v45 = vsel %vm942_vm11, %v1583_v18, %v1578_v15  ;;  %v1096_v46 = vsel %vm942_vm11, %v1584_v16, %v1579_v14 }
 0x73f   : > { %v1434_v48 = vpack.c.bf16 %v1094_v23, %v1093_v19  ;;  %v1439_v27 = vpack.c.bf16 %v1096_v46, %v1095_v45 }
 0x741   : > { %1435 = vmatprep.subr.msk.bf16.mxu0 %vm2100_vm14, %v1434_v48 }
 0x742   : > { %1440 = vmatpush1.bf16.msk.msra.mxu0 %vm1422_vm15, %v1439_v27 }
 0x745   : > { %1441 = vmatmul.mubr.msk.bf16.vlgmr.msra.gmra.mxu0 %vm347_vm0, %v1596_v49 }
 0x746   : > { %v1208_v31 = vpop.permute.xlu1 %1207 }
 0x748   : > { %v1213_v37 = vpop.permute.xlu0 %1212 }
 0x78d   : > { %v1196_v28 = vpop.f32.mrf.mxu1 }
 0x78f   : > { %v1198_v29 = vpop.f32.mrf.mxu1 }
 0x791   : > { %v1200_v33 = vpop.f32.mrf.mxu1 }
 0x793   : > { %v1202_v35 = vpop.f32.mrf.mxu1 }
 0x805   : > { %v1145_v30 = vpop.f32.mrf.mxu0 }
 0x806   : > { %v1197_v17 = vadd.f32 %v1196_v28, %v1145_v30 }
 0x807   : > { %v1147_v32 = vpop.f32.mrf.mxu0 }
 0x808   : > { %v1215_v26 = vadd.f32 %v1208_v31, %v1197_v17  ;;  %v1199_v34 = vadd.f32 %v1198_v29, %v1147_v32 }
 0x809   : > { %v1149_v36 = vpop.f32.mrf.mxu0 }
 0x80a   : > { %v1219_v38 = vmax.f32 %v1215_v26, 0.0  ;;  %v1216_v20 = vadd.f32 %v1208_v31, %v1199_v34  ;;  %v1201_v39 = vadd.f32 %v1200_v33, %v1149_v36 }
 0x80b   : > { %v1151_v40 = vpop.f32.mrf.mxu0 }
 0x80c   : > { %v1223_v41 = vadd.f32 %v1219_v38, %v2057_v21  ;;  %v1220_v42 = vmax.f32 %v1216_v20, 0.0  ;;  %v1217_v43 = vadd.f32 %v1213_v37, %v1201_v39  ;;  %v1203_v44 = vadd.f32 %v1202_v35, %v1151_v40 }
 0x80e   : > { %v1227_v47 = vmax.f32 %v1223_v41, 0.0  ;;  %v1224_v5 = vadd.f32 %v1220_v42, %v2062_v24  ;;  %v1221_v6 = vmax.f32 %v1217_v43, 0.0  ;;  %v1218_v7 = vadd.f32 %v1213_v37, %v1203_v44 }
 0x810   : > { %1231 = vst [vmem:[%s278_s14] sm:$0xff] %v1227_v47  ;;  %v1228_v50 = vmax.f32 %v1224_v5, 0.0  ;;  %v1225_v9 = vadd.f32 %v1221_v6, %v2059_v22  ;;  %v1222_v51 = vmax.f32 %v1218_v7, 0.0 }
 0x812   : > { %1232 = vst [vmem:[%s278_s14 + $0x8] sm:$0xff] %v1228_v50  ;;  %v1229_v21 = vmax.f32 %v1225_v9, 0.0  ;;  %v1226_v24 = vadd.f32 %v1222_v51, %v2064_v25 }
 0x814   : > { %1233 = vst [vmem:[%s278_s14 + $0x10] sm:$0xff] %v1229_v21  ;;  %v1230_v52 = vmax.f32 %v1226_v24, 0.0 }
 0x816   : > { %1234 = vst [vmem:[%s278_s14 + $0x18] sm:$0xff] %v1230_v52 }
 0x817   : > { %1662 = shalt.err (!%p1659_p7)
}
 0x818   : > { %s1663_s28 = scalar_lea.hbm %s2152_s13, 512  ;;  %s1667_s12 = scalar_lea.hbm %s2202_s5, 1024 }
 0x819   : > { %p1664_p4 = scmp.ne.s32.totalorder %s2152_s13, %s1663_s28  ;;  %p1668_p10 = scmp.lt.s32.totalorder %s2152_s13, %s2202_s5 }
 0x81a   : > { %p1669_p11 = scmp.lt.s32.totalorder %s1667_s12, %s1663_s28 }
 0x81b   : > { %p1665_p5 = pnand %p1664_p4, %p2226_p0 }
 0x81c   : > { %p1670_p12 = por %p1669_p11, %p1668_p10 }
 0x81d   : > { %p1666_p6 = pneg %p1665_p5 }
 0x81f   : > { %p1671_p1 = pnand %p1670_p12, %p1666_p6 }
 0x821   : > { %1674 = shalt.err (!%p1671_p1)
}
 0x822   : > { %s1728_s14 = smov 256   ;;  %s1729_s15 = smov 512  }
 0x823   : > { %s1730_s16 = smov 16  }
 0x824   : > { %1462 = dma.vmem_to_hbm [thread:$0]  (%p2226_p0), %s2146_s6, 512, %s2152_s13, %s2156_s23, %s1728_s14, %s1729_s15, %s1730_s16  }
 0x825 PF: > { %s1264_s17 = sand.u32 1, %s1705_s18   ;;  %p2227_p9 = scmp.ne.s32.totalorder %s2207_s30, 0 }
 0x826   : > { %s1265_s22 = scalar_lea.sflag [#allocation5], %s1264_s17 }
 0x827   : > { %p1472_p13 = pnand %p1343_p8, %p2227_p9 }
 0x829   : > { %p1473_p2 = pneg %p1472_p13 }
 0x82b   : > { %1700 = dma.done.wait (%p1473_p2), %s1265_s22, 512  }
 0x82c   : > { %1702 = vsyncadd (%p1473_p2), %s1265_s22, 4294966784  ;;  %p17_p3 = scmp.ge.s32.totalorder %s1786_s24, 4   ;;  %s2228_s18 = smov %s1709_s19 }
 0x82d   : > { %s2229_s19 = smov %s1713_s20  ;;  %s2230_s20 = smov %s1798_s27 }
 0x82e   : > { %s2231_s21 = smov %s1786_s24  ;;  %19 = sbr.rel (!%p17_p3) target bundleno = 5 (0x5), region = 120 }
 0x833   :  { %1270 = vsyncpa [#allocation4], 1 }
 0x834   :  { %1272 = vsyncpa [#allocation4 + $0x1], 1 }
 0x835   :  { %1273 = vsyncpa [#allocation7], 1 }
 0x836   :  { %1274 = vsyncpa [#allocation5], 1 }
 0x837   :  { %1276 = vsyncpa [#allocation5 + $0x1], 1 }

</bundles_post_ra>
